<compile_context>
chip_gen: v7x
topology: tpu7x:2x2x1
jax: 0.10.0
libtpu: 0.0.40
codegen_flags: <defaults>
</compile_context>

<pallas_src>
import jax
import jax.numpy as jnp
from jax.experimental import pallas as pl
from jax.experimental.pallas import tpu as pltpu


def _sigmoid_kernel(x_ref, o_ref):
    # Single-transcendental sigmoid: sigmoid(x) = 0.5 * (tanh(x/2) + 1).
    # tanh goes to the EUP (1 push/element); the rest is cheap VPU work.
    # Upcast to f32 for compute (no-op for f32), cast back on store.
    x = x_ref[...].astype(jnp.float32)
    o_ref[...] = (0.5 * (jnp.tanh(0.5 * x) + 1.0)).astype(o_ref.dtype)


# Lane widths tried (widest first) so the flat tensor reshapes with no padding.
_LANE_CANDIDATES = (4096, 2048, 1024, 512, 256, 128)
# Above this size we are willing to split a single-block array into >=2 grid
# steps (only matters on v7x, which has 2 TensorCores).
_MIN_SPLIT_BYTES = 512 * 1024


def _chip_plan():
    """Generation-aware (block_bytes, vmem_limit_bytes_or_None, min_grid_steps)."""
    kind = ""
    try:
        kind = jax.devices()[0].device_kind.lower()
    except Exception:
        pass
    if "v6" in kind:
        # v6e: 128 MiB physical VMEM. 8 MiB blocks x (in+out) x 2 bufs = 32 MiB,
        # raise the scoped limit to 64 MiB to clear the 32 MiB default.
        return 8 * 1024 * 1024, 64 * 1024 * 1024, 1
    if "v7" in kind or "7x" in kind:
        # v7x: 64 MiB physical VMEM per TC -> 48 MiB scoped limit; keep >= 2
        # grid steps so both TensorCores are driven.
        return 8 * 1024 * 1024, 48 * 1024 * 1024, 2
    # v5e (16 MiB scoped-VMEM default) and unknown chips: 2 MiB blocks,
    # 4x-buffered footprint = 8 MiB, safely under the default limit.
    return 2 * 1024 * 1024, None, 1


def _compiler_params(vmem_limit):
    kwargs = dict(dimension_semantics=("parallel",))
    if vmem_limit is not None:
        kwargs["vmem_limit_bytes"] = vmem_limit
    return pltpu.CompilerParams(**kwargs)


def _sigmoid_pallas_impl(x: jax.Array) -> jax.Array:
    """Elementwise sigmoid via a Pallas TPU kernel. Matches torch.nn.Sigmoid."""
    orig_shape = x.shape
    dtype = x.dtype
    total = x.size
    itemsize = jnp.dtype(dtype).itemsize

    block_bytes, vmem_limit, min_steps = _chip_plan()
    cparams = _compiler_params(vmem_limit)
    cost = pl.CostEstimate(
        flops=3 * total,             # mul, add, mul around the tanh
        transcendentals=total,       # one tanh per element
        bytes_accessed=2 * total * itemsize,
    )

    # --- Choose a lane-dense 2D layout (rows, lanes) with ZERO padding. ---
    lanes = None
    for cand in _LANE_CANDIDATES:
        if total % cand == 0:
            lanes = cand
            break

    if lanes is None:
        # Rare ragged fallback (size not a multiple of 128): run a pad-free 1D
        # kernel over the flat array; the ragged last block is masked by
        # Pallas. No jnp.pad / slice-back => no extra HBM passes.
        flat = x.reshape(-1)
        block_len = max(8 * 128, ((block_bytes // itemsize) // 1024) * 1024)
        if block_len >= total:
            block_len = total      # single full block (tiling constraint waived)
            grid = (1,)
        else:
            grid = (pl.cdiv(total, block_len),)
        out1d = pl.pallas_call(
            _sigmoid_kernel,
            out_shape=jax.ShapeDtypeStruct((total,), dtype),
            grid_spec=pltpu.PrefetchScalarGridSpec(
                num_scalar_prefetch=0,
                grid=grid,
                in_specs=[pl.BlockSpec((block_len,), lambda i: (i,))],
                out_specs=pl.BlockSpec((block_len,), lambda i: (i,)),
            ),
            compiler_params=cparams,
            cost_estimate=cost,
        )(flat)
        return out1d.reshape(orig_shape)

    rows = total // lanes
    x2d = x.reshape(rows, lanes)

    # Min sublane multiple per dtype: 8 for f32, 16 for bf16, 32 for 8-bit.
    sub_mult = max(8, 32 // itemsize)
    target_rows = max(sub_mult, block_bytes // (lanes * itemsize))

    if target_rows >= rows:
        if (min_steps >= 2
                and rows >= 2 * sub_mult
                and total * itemsize >= _MIN_SPLIT_BYTES):
            # v7x: split into (at least) 2 steps so both TensorCores work.
            tile_rows = max(sub_mult, (((rows + 1) // 2) // sub_mult) * sub_mult)
        else:
            # Whole array as one block: (8,128) divisibility waived, no
            # per-step overhead for small inputs.
            tile_rows = rows
    else:
        tile_rows = max(sub_mult, (target_rows // sub_mult) * sub_mult)

    grid = (pl.cdiv(rows, tile_rows),)   # ragged last row-block is masked

    out2d = pl.pallas_call(
        _sigmoid_kernel,
        out_shape=jax.ShapeDtypeStruct((rows, lanes), dtype),
        grid_spec=pltpu.PrefetchScalarGridSpec(
            num_scalar_prefetch=0,
            grid=grid,
            in_specs=[pl.BlockSpec((tile_rows, lanes), lambda i: (i, 0))],
            out_specs=pl.BlockSpec((tile_rows, lanes), lambda i: (i, 0)),
        ),
        compiler_params=cparams,
        cost_estimate=cost,
    )(x2d)
    return out2d.reshape(orig_shape)


# Run the wrapper under jit so the reshapes are layout no-ops fused around the
# pallas_call rather than separate eager HBM passes.
sigmoid_pallas = jax.jit(_sigmoid_pallas_impl)


if __name__ == "__main__":
    key = jax.random.PRNGKey(0)
    # NCHW input, small shapes consistent with the module's forward.
    x = jax.random.normal(key, (2, 4, 16, 16), dtype=jnp.float32)

    out = jax.block_until_ready(sigmoid_pallas(x))
    ref = jax.nn.sigmoid(x)
    assert out.shape == x.shape and out.dtype == x.dtype
    assert jnp.allclose(out, ref, atol=1e-5, rtol=1e-5)

    # Also exercise the pad-free ragged fallback (size not a multiple of 128).
    x_odd = jax.random.normal(jax.random.PRNGKey(1), (3, 5, 149), dtype=jnp.float32)
    out_odd = jax.block_until_ready(sigmoid_pallas(x_odd))
    assert jnp.allclose(out_odd, jax.nn.sigmoid(x_odd), atol=1e-5, rtol=1e-5)

    print("KERNEL_OK")
</pallas_src>

<mosaic_0001>
module attributes {stable_mosaic.version = 11 : i64} {
  func.func @_sigmoid_kernel(%arg0: i32, %arg1: memref<1x2048xf32, #tpu.memory_space<vmem>>, %arg2: memref<1x2048xf32, #tpu.memory_space<vmem>>) attributes {dimension_semantics = [#tpu.dimension_semantics<parallel>], iteration_bounds = array<i64: 1>, scalar_prefetch = 0 : i64, scratch_operands = 0 : i64, tpu.core_type = #tpu.core_type<tc>, window_params = [{transform_indices = @transform_0, window_bounds = array<i64: 1, 2048>}, {transform_indices = @transform_1, window_bounds = array<i64: 1, 2048>}]} {
    %c0 = arith.constant 0 : index
    %c0_0 = arith.constant 0 : index
    %0 = vector.load %arg1[%c0, %c0_0] : memref<1x2048xf32, #tpu.memory_space<vmem>>, vector<1x2048xf32>
    %cst = arith.constant 5.000000e-01 : f32
    %1 = vector.broadcast %cst : f32 to vector<1x2048xf32>
    %2 = arith.mulf %1, %0 : vector<1x2048xf32>
    %3 = math.tanh %2 : vector<1x2048xf32>
    %cst_1 = arith.constant 1.000000e+00 : f32
    %4 = vector.broadcast %cst_1 : f32 to vector<1x2048xf32>
    %5 = arith.addf %3, %4 : vector<1x2048xf32>
    %cst_2 = arith.constant 5.000000e-01 : f32
    %6 = vector.broadcast %cst_2 : f32 to vector<1x2048xf32>
    %7 = arith.mulf %6, %5 : vector<1x2048xf32>
    %c0_3 = arith.constant 0 : index
    %c0_4 = arith.constant 0 : index
    %8 = vector.load %arg2[%c0_3, %c0_4] : memref<1x2048xf32, #tpu.memory_space<vmem>>, vector<1x2048xf32>
    tpu.vector_store %arg2[%c0_3, %c0_4], %7 {strides = array<i32>} : memref<1x2048xf32, #tpu.memory_space<vmem>>, vector<1x2048xf32>,
    return
  }
  func.func @transform_0(%arg0: i32) -> (i32, i32) {
    %c0_i32 = arith.constant 0 : i32
    %c0_i32_0 = arith.constant 0 : i32
    return %arg0, %c0_i32 : i32, i32
  }
  func.func @transform_1(%arg0: i32) -> (i32, i32) {
    %c0_i32 = arith.constant 0 : i32
    %c0_i32_0 = arith.constant 0 : i32
    return %arg0, %c0_i32 : i32, i32
  }
}

</mosaic_0001>

<bundles_post_ra>
// kernel: _sigmoid_pallas_impl.1
= control target key start
LH: loop header
LB: loop body
LE: loop exit
PB: predicated region body
PF: predicated region fallthrough
CT: control target
= control target key end

     0   :  { %s50_s0 = inlined_call_operand.vmem [shape: f32[1,2048], index: 0, kind: input, shape index: {}]   ;;  %s51_s1 = inlined_call_operand.vmem [shape: f32[1,2048], index: 1, kind: output, shape index: {}]  }
   0x1   :  { %v8_v0 = vld [vmem:[%s50_s0] sm:$0xff]  ;;  %v9_v1 = vld [vmem:[%s50_s0 + $0x8] sm:$0xff] }
   0x2   :  { %v10_v2 = vmul.f32 0.5, %v8_v0  ;;  %v11_v3 = vmul.f32 0.5, %v9_v1 }
   0x4   :  { %24 = vtanh.f32 %v10_v2 }
   0x5   :  { %26 = vtanh.f32 %v11_v3 }
   0xe   :  { %v25_v4 = vpop.eup %24 }
   0xf   :  { %v27_v5 = vpop.eup %26  ;;  %v14_v6 = vadd.f32 1.0, %v25_v4 }
  0x10   :  { %v15_v7 = vadd.f32 1.0, %v27_v5 }
  0x11   :  { %v16_v8 = vmul.f32 0.5, %v14_v6 }
  0x12   :  { %v17_v9 = vmul.f32 0.5, %v15_v7 }
  0x13   :  { %18 = vst [vmem:[%s51_s1] sm:$0xff] %v16_v8 }
  0x14   :  { %19 = vst [vmem:[%s51_s1 + $0x8] sm:$0xff] %v17_v9 }

</bundles_post_ra>
